<compile_context>
chip_gen: v5e
topology: v5e:2x2
jax: 0.10.0
libtpu: 0.0.40
codegen_flags: <defaults>
</compile_context>

<pallas_src>
import jax
import jax.numpy as jnp
from jax.experimental import pallas as pl
from jax.experimental.pallas import tpu as pltpu


def swish_kernel(x_ref, o_ref):
    x = x_ref[...]
    xf = x.astype(jnp.float32)               # no-op for f32 inputs
    o_ref[...] = (xf * jax.nn.sigmoid(xf)).astype(o_ref.dtype)


def swish(x, *, tile_rows=1024):
    """Elementwise x * sigmoid(x) for an arbitrary-shaped array."""
    orig_shape = x.shape
    dtype = x.dtype
    total = x.size

    if total == 0:
        return x

    # Lane-dense layout: widest lane count (multiple of 128) dividing the flat
    # size so the reshape is free and no padding copy is required.
    pad = 0
    for lane in (512, 256, 128):
        if total % lane == 0:
            break
    else:
        lane = 128
        pad = (-total) % lane                 # rare ragged case only

    flat = x.reshape(-1)
    if pad:
        flat = jnp.pad(flat, (0, pad))        # swish(0) == 0, padding harmless
    rows = (total + pad) // lane
    x2 = flat.reshape(rows, lane)

    # Sublane-packing minimum for the second-to-last block dim.
    sublane = {4: 8, 2: 16, 1: 32}.get(jnp.dtype(dtype).itemsize, 8)

    if rows <= tile_rows:
        # Single block equal to the full array dims: always layout-legal,
        # zero wasted bandwidth.
        block_rows = rows
        grid = (1,)
    else:
        block_rows = (max(tile_rows, sublane) // sublane) * sublane
        grid = (pl.cdiv(rows, block_rows),)   # partial last block is masked

    out2 = pl.pallas_call(
        swish_kernel,
        out_shape=jax.ShapeDtypeStruct((rows, lane), dtype),
        grid_spec=pltpu.PrefetchScalarGridSpec(
            num_scalar_prefetch=0,
            grid=grid,
            in_specs=[pl.BlockSpec((block_rows, lane), lambda i: (i, 0))],
            out_specs=pl.BlockSpec((block_rows, lane), lambda i: (i, 0)),
        ),
        compiler_params=pltpu.CompilerParams(
            dimension_semantics=("parallel",),       # megacore-shard row grid
            vmem_limit_bytes=32 * 1024 * 1024,       # headroom for double-buffered tiles
        ),
    )(x2)

    if pad:
        return out2.reshape(-1)[:total].reshape(orig_shape)
    return out2.reshape(orig_shape)


def _ref_swish(x):
    xf = x.astype(jnp.float32)
    return (xf * jax.nn.sigmoid(xf)).astype(x.dtype)


if __name__ == "__main__":
    key = jax.random.PRNGKey(0)

    # Primary check: shape implied by the module usage (NCHW activation map).
    x = jax.random.normal(key, (2, 4, 16, 16), jnp.float32)
    out = jax.block_until_ready(swish(x))
    assert out.shape == x.shape and out.dtype == x.dtype
    assert jnp.allclose(out, _ref_swish(x), atol=1e-5, rtol=1e-5)

    # Ragged size (exercises the padding fallback path).
    k1, k2, k3 = jax.random.split(key, 3)
    xr = jax.random.normal(k1, (3, 5, 7), jnp.float32)
    assert jnp.allclose(jax.block_until_ready(swish(xr)), _ref_swish(xr),
                        atol=1e-5, rtol=1e-5)

    # bf16 input (exercises dtype cast path).
    xb = jax.random.normal(k2, (2, 8, 32), jnp.bfloat16)
    assert jnp.allclose(jax.block_until_ready(swish(xb)).astype(jnp.float32),
                        _ref_swish(xb).astype(jnp.float32), atol=1e-2, rtol=1e-2)

    # Multi-tile grid with a partial edge block (rows % block_rows != 0).
    xg = jax.random.normal(k3, (130, 512), jnp.float32)
    assert jnp.allclose(jax.block_until_ready(swish(xg, tile_rows=64)),
                        _ref_swish(xg), atol=1e-5, rtol=1e-5)

    # TODO(synk): `inplace=True` in-place mutation has no JAX equivalent
    # (immutable arrays); the functional result is returned instead.
    print("KERNEL_OK")
</pallas_src>

<mosaic_0001>
module attributes {stable_mosaic.version = 11 : i64} {
  func.func @swish_kernel(%arg0: i32, %arg1: memref<4x512xf32, #tpu.memory_space<vmem>>, %arg2: memref<4x512xf32, #tpu.memory_space<vmem>>) attributes {dimension_semantics = [#tpu.dimension_semantics<parallel>], iteration_bounds = array<i64: 1>, scalar_prefetch = 0 : i64, scratch_operands = 0 : i64, tpu.core_type = #tpu.core_type<tc>, window_params = [{transform_indices = @transform_0, window_bounds = array<i64: 4, 512>}, {transform_indices = @transform_1, window_bounds = array<i64: 4, 512>}]} {
    %c0 = arith.constant 0 : index
    %c0_0 = arith.constant 0 : index
    %0 = vector.load %arg1[%c0, %c0_0] : memref<4x512xf32, #tpu.memory_space<vmem>>, vector<4x512xf32>
    %1 = arith.negf %0 : vector<4x512xf32>
    %2 = math.exp %1 : vector<4x512xf32>
    %cst = arith.constant 1.000000e+00 : f32
    %3 = vector.broadcast %cst : f32 to vector<4x512xf32>
    %4 = arith.addf %3, %2 : vector<4x512xf32>
    %5 = arith.divf %3, %4 : vector<4x512xf32>
    %6 = arith.mulf %0, %5 : vector<4x512xf32>
    %c0_1 = arith.constant 0 : index
    %c0_2 = arith.constant 0 : index
    %7 = vector.load %arg2[%c0_1, %c0_2] : memref<4x512xf32, #tpu.memory_space<vmem>>, vector<4x512xf32>
    tpu.vector_store %arg2[%c0_1, %c0_2], %6 {strides = array<i32>} : memref<4x512xf32, #tpu.memory_space<vmem>>, vector<4x512xf32>,
    return
  }
  func.func @transform_0(%arg0: i32) -> (i32, i32) {
    %c0_i32 = arith.constant 0 : i32
    %c0_i32_0 = arith.constant 0 : i32
    return %arg0, %c0_i32 : i32, i32
  }
  func.func @transform_1(%arg0: i32) -> (i32, i32) {
    %c0_i32 = arith.constant 0 : i32
    %c0_i32_0 = arith.constant 0 : i32
    return %arg0, %c0_i32 : i32, i32
  }
}

</mosaic_0001>

<bundles_post_ra>
// kernel: tpu_custom_call.1
= control target key start
LH: loop header
LB: loop body
LE: loop exit
PB: predicated region body
PF: predicated region fallthrough
CT: control target
= control target key end

     0   :  { %6 = vsyncpa [#allocation3], 0  ;;  %s166_s0 = inlined_call_operand.hbm [shape: f32[4,512], index: 0, kind: input, shape index: {}]   ;;  %s167_s1 = inlined_call_operand.hbm [shape: f32[4,512], index: 1, kind: output, shape index: {}]  }
   0x1   :  { %7 = vsyncpa [#allocation4], 0  ;;  %s13_s8 = sshll.u32 %s166_s0, 4  ;;  %s148_s9 = smov [#allocation2]   ;;  %s14_s8 = int_to_ptr.hbm [resolvable:$true] %s13_s8 }
   0x2   :  { %s15_s10 = sshll.u32 %s148_s9, 4  ;;  %s16_s10 = int_to_ptr.vmem [resolvable:$true] %s15_s10 }
   0x3   :  { %18 = dma.hbm_to_vmem [thread:$0]  %s14_s8, 256, %s16_s10, [#allocation3]  }
   0x4   :  { %144 = dma.done.wait [#allocation3], 256  }
   0x5   :  { %145 = vsyncadd [#allocation3], 4294967040  ;;  %v23_v0 = vld [vmem:[#allocation2] sm:$0xff]  ;;  %v24_v1 = vld [vmem:[#allocation2 + $0x8] sm:$0xff]  ;;  %s149_s0 = smov [#allocation5]   ;;  %s74_s14 = sshll.u32 %s167_s1, 4  ;;  %s75_s14 = int_to_ptr.hbm [resolvable:$true] %s74_s14 }
   0x6   :  { %v84_v2 = vmul.f32 -1.442695, %v23_v0  ;;  %v85_v3 = vmul.f32 -1.442695, %v24_v1  ;;  %s72_s11 = sshll.u32 %s149_s0, 4  ;;  %s73_s11 = int_to_ptr.vmem [resolvable:$true] %s72_s11 }
   0x8   :  { %88 = vpow2.f32 %v84_v2 }
   0x9   :  { %90 = vpow2.f32 %v85_v3 }
   0xe   :  { %v89_v4 = vpop.eup %88 }
   0xf   :  { %v91_v5 = vpop.eup %90  ;;  %v31_v6 = vadd.f32 1.0, %v89_v4 }
  0x10   :  { %v32_v7 = vadd.f32 1.0, %v91_v5 }
  0x11   :  { %92 = vrcp.f32 %v31_v6  ;;  %vm38_vm0 = vweird.f32 %v31_v6  ;;  %v44_v11 = vand.u32 2147483648, %v31_v6  ;;  %v42_v14 = vand.u32 2147483647, %v31_v6 }
  0x12   :  { %94 = vrcp.f32 %v32_v7  ;;  %v59_v15 = vand.u32 2147483648, %v32_v7  ;;  %vm53_vm2 = vweird.f32 %v32_v7  ;;  %v57_v17 = vand.u32 2147483647, %v32_v7 }
  0x13   :  { %v45_v19 = vor.u32 1.1754944e-38, %v44_v11  ;;  %vm43_vm5 = vcmp.eq.f32.partialorder %v42_v14, 8.507059e+37 }
  0x14   :  { %v60_v22 = vor.u32 1.1754944e-38, %v59_v15  ;;  %vm58_vm7 = vcmp.eq.f32.partialorder %v57_v17, 8.507059e+37 }
  0x17   :  { %v93_v8 = vpop.eup %92 }
  0x18   :  { %v95_v9 = vpop.eup %94  ;;  %v34_v10 = vmul.f32 %v93_v8, %v31_v6  ;;  %vm39_vm1 = vweird.f32 %v93_v8 }
  0x19   :  { %v49_v12 = vmul.f32 %v95_v9, %v32_v7  ;;  %vm54_vm3 = vweird.f32 %v95_v9  ;;  %vm40_vm4 = vmor %vm38_vm0, %vm39_vm1 }
  0x1a   :  { %v35_v13 = vsub.f32 1.0, %v34_v10  ;;  %vm55_vm6 = vmor %vm53_vm2, %vm54_vm3 }
  0x1b   :  { %v50_v16 = vsub.f32 1.0, %v49_v12 }
  0x1c   :  { %v36_v18 = vmul.f32 %v93_v8, %v35_v13 }
  0x1d   :  { %v51_v20 = vmul.f32 %v95_v9, %v50_v16 }
  0x1e   :  { %v37_v21 = vadd.f32 %v93_v8, %v36_v18 }
  0x1f   :  { %v52_v23 = vadd.f32 %v95_v9, %v51_v20 }
  0x20   :  { %v41_v24 = vsel %vm40_vm4, %v93_v8, %v37_v21 }
  0x21   :  { %v46_v25 = vsel %vm43_vm5, %v45_v19, %v41_v24  ;;  %v56_v26 = vsel %vm55_vm6, %v95_v9, %v52_v23 }
  0x22   :  { %v63_v27 = vmul.f32 %v46_v25, %v23_v0  ;;  %v61_v28 = vsel %vm58_vm7, %v60_v22, %v56_v26 }
  0x23   :  { %v64_v29 = vmul.f32 %v61_v28, %v24_v1 }
  0x24   :  { %65 = vst [vmem:[#allocation5] sm:$0xff] %v63_v27 }
  0x25   :  { %66 = vst [vmem:[#allocation5 + $0x8] sm:$0xff] %v64_v29 }
  0x26   :  { %77 = dma.vmem_to_hbm [thread:$0]  %s73_s11, 256, %s75_s14, [#allocation4]  }
  0x27   :  { %146 = dma.done.wait [#allocation4], 256  }
  0x28   :  { %147 = vsyncadd [#allocation4], 4294967040 }
  0x29   :  { %82 = vsyncpa [#allocation3], 1 }
  0x2a   :  { %83 = vsyncpa [#allocation4], 1 }

</bundles_post_ra>
